<compile_context>
chip_gen: v6e
topology: v6e:2x2x1
jax: 0.10.0
libtpu: 0.0.40
codegen_flags: <defaults>
</compile_context>

<pallas_src>
import functools

import jax
import jax.numpy as jnp
from jax.experimental import pallas as pl
from jax.experimental.pallas import tpu as pltpu

BN_EPS = 1e-5
LANE = 128


def _default_vmem_limit():
    """Per-generation scoped-VMEM limit (~70% of physical, capped)."""
    try:
        cap = int(pltpu.get_tpu_info().vmem_capacity_bytes)
        return max(32 * 1024 * 1024, min(int(cap * 0.7), 96 * 1024 * 1024))
    except Exception:  # pragma: no cover - conservative fallback
        return 32 * 1024 * 1024


VMEM_LIMIT = _default_vmem_limit()


def _round_up(x, m):
    return ((x + m - 1) // m) * m


def _pad_to(a, target, axis=-1, value=0.0):
    pad = target - a.shape[axis]
    if pad == 0:
        return a
    cfg = [(0, 0)] * a.ndim
    cfg[axis] = (0, pad)
    return jnp.pad(a, cfg, constant_values=value)


def _pick_row_tile(Ho, Wo, target_rows=512):
    """Largest divisor of Ho with TR*Wo <= target_rows (>=1)."""
    cap = max(1, target_rows // max(Wo, 1))
    tr = 1
    for d in range(1, Ho + 1):
        if Ho % d == 0 and d <= cap:
            tr = d
    return tr


# ----------------------------------------------------------------------------
# Pallas kernels
# ----------------------------------------------------------------------------
def _matmul_bn_act_kernel(x_ref, w_ref, s_ref, b_ref, o_ref, *, act):
    """out = act((x @ w) * scale + bias) -- 1x1 convs / im2col conv1."""
    y = jnp.dot(x_ref[...], w_ref[...], preferred_element_type=jnp.float32)
    y = y * s_ref[...] + b_ref[...]
    if act == "relu6":
        y = jnp.clip(y, 0.0, 6.0)
    o_ref[...] = y.astype(o_ref.dtype)


def matmul_bn_act(x2d, w, scale, bias, act, tile_m=512, out_dtype=jnp.bfloat16):
    """Row-tiled fused matmul + BN + relu6 with resident weights."""
    M, K = x2d.shape
    N = w.shape[1]
    TM = min(tile_m, _round_up(M, 16))
    Mp = _round_up(M, TM)
    xp = jnp.pad(x2d, ((0, Mp - M), (0, 0))) if Mp != M else x2d

    out = pl.pallas_call(
        functools.partial(_matmul_bn_act_kernel, act=act),
        out_shape=jax.ShapeDtypeStruct((Mp, N), out_dtype),
        grid=(Mp // TM,),
        in_specs=[
            pl.BlockSpec((TM, K), lambda i: (i, 0)),
            pl.BlockSpec((K, N), lambda i: (0, 0)),   # weight resident
            pl.BlockSpec((1, N), lambda i: (0, 0)),
            pl.BlockSpec((1, N), lambda i: (0, 0)),
        ],
        out_specs=pl.BlockSpec((TM, N), lambda i: (i, 0)),
        compiler_params=pltpu.CompilerParams(
            dimension_semantics=("parallel",),
            vmem_limit_bytes=VMEM_LIMIT,
        ),
    )(xp, w, scale.reshape(1, N), bias.reshape(1, N))
    return out[:M] if Mp != M else out


def _dw_proj_kernel(x_ref, wd_ref, sd_ref, bd_ref, wp_ref, sp_ref, bp_ref,
                    *rest, K, stride, TR, Wo, Hph, has_residual):
    """Fused depthwise KxK conv +BN+relu6 -> project 1x1 +BN (+residual).

    x_ref : (stride^2 * Hph, Wph, C) resident (phase-decomposed if stride>1)
            so every tap below is a unit-stride slice.
    o_ref : (TR, Wo, Co) for the current output-row tile (grid axis 1).
    The expanded hidden tensor never leaves VMEM/registers.
    """
    if has_residual:
        r_ref, o_ref = rest
    else:
        (o_ref,) = rest
    s = stride
    C = wd_ref.shape[-1]
    r0 = pl.program_id(1) * TR

    acc = jnp.zeros((TR, Wo, C), jnp.float32)
    for i in range(K):
        for j in range(K):
            ph = (i % s) * s + (j % s)
            win = x_ref[pl.ds(ph * Hph + i // s + r0, TR),
                        pl.ds(j // s, Wo), :]
            acc = acc + win.astype(jnp.float32) * wd_ref[i, j, :].astype(jnp.float32)

    hid = jnp.clip(acc * sd_ref[0, :] + bd_ref[0, :], 0.0, 6.0)

    # project 1x1: (TR*Wo, C) @ (C, Co) on the MXU, f32 accumulation
    y = jnp.dot(hid.reshape(TR * Wo, C).astype(jnp.bfloat16), wp_ref[...],
                preferred_element_type=jnp.float32)
    y = y * sp_ref[...] + bp_ref[...]
    if has_residual:
        y = y + r_ref[...].reshape(TR * Wo, -1).astype(jnp.float32)
    o_ref[...] = y.reshape(TR, Wo, -1).astype(o_ref.dtype)


def dw_project(x_nhwc, dw, proj, stride, pad, residual=None,
               out_dtype=jnp.bfloat16):
    """Depthwise conv + BN + relu6 fused with project 1x1 + BN (+residual)."""
    N, H, W, C = x_nhwc.shape
    K = dw["w"].shape[0]
    s = stride
    xp = jnp.pad(x_nhwc, ((0, 0), (pad, pad), (pad, pad), (0, 0)))
    Hp, Wp = xp.shape[1], xp.shape[2]
    Ho = (Hp - K) // s + 1
    Wo = (Wp - K) // s + 1
    Co = proj["w"].shape[1]

    if s == 1:
        xph, Hph, Wph = xp, Hp, Wp
    else:
        # Phase decomposition: phase (p, q) holds xp[:, p::s, q::s, :], so
        # in-kernel taps are unit-stride slices of a single phase.
        Hph = -(-Hp // s)
        Wph = -(-Wp // s)
        xph = jnp.pad(xp, ((0, 0), (0, Hph * s - Hp), (0, Wph * s - Wp), (0, 0)))
        xph = xph.reshape(N, Hph, s, Wph, s, C).transpose(0, 2, 4, 1, 3, 5)
        xph = xph.reshape(N, s * s * Hph, Wph, C)

    TR = _pick_row_tile(Ho, Wo)
    kern = functools.partial(_dw_proj_kernel, K=K, stride=s, TR=TR, Wo=Wo,
                             Hph=Hph, has_residual=residual is not None)

    in_specs = [
        pl.BlockSpec((None, s * s * Hph, Wph, C), lambda n, r: (n, 0, 0, 0)),
        pl.BlockSpec((K, K, C), lambda n, r: (0, 0, 0)),
        pl.BlockSpec((1, C), lambda n, r: (0, 0)),
        pl.BlockSpec((1, C), lambda n, r: (0, 0)),
        pl.BlockSpec((C, Co), lambda n, r: (0, 0)),   # project weight resident
        pl.BlockSpec((1, Co), lambda n, r: (0, 0)),
        pl.BlockSpec((1, Co), lambda n, r: (0, 0)),
    ]
    args = [xph, dw["w"], dw["scale"].reshape(1, C), dw["bias"].reshape(1, C),
            proj["w"], proj["scale"].reshape(1, Co), proj["bias"].reshape(1, Co)]
    if residual is not None:
        in_specs.append(pl.BlockSpec((None, TR, Wo, Co),
                                     lambda n, r: (n, r, 0, 0)))
        args.append(residual)

    return pl.pallas_call(
        kern,
        out_shape=jax.ShapeDtypeStruct((N, Ho, Wo, Co), out_dtype),
        grid=(N, Ho // TR),
        in_specs=in_specs,
        out_specs=pl.BlockSpec((None, TR, Wo, Co), lambda n, r: (n, r, 0, 0)),
        compiler_params=pltpu.CompilerParams(
            dimension_semantics=("parallel", "parallel"),
            vmem_limit_bytes=VMEM_LIMIT,
        ),
    )(*args)


def _pool_linear_kernel(x_ref, w_ref, b_ref, o_ref):
    """Global average pool over HW + final linear layer."""
    pooled = jnp.mean(x_ref[...].astype(jnp.float32), axis=1)  # (N, C)
    y = jnp.dot(pooled, w_ref[...], preferred_element_type=jnp.float32)
    o_ref[...] = y + b_ref[...]


def pool_linear(x_nhwc, w, b):
    N, H, W, C = x_nhwc.shape
    classes_p = w.shape[1]
    x3 = x_nhwc.reshape(N, H * W, C)
    return pl.pallas_call(
        _pool_linear_kernel,
        out_shape=jax.ShapeDtypeStruct((N, classes_p), jnp.float32),
        grid=(1,),
        in_specs=[
            pl.BlockSpec((N, H * W, C), lambda i: (0, 0, 0)),
            pl.BlockSpec((C, classes_p), lambda i: (0, 0)),
            pl.BlockSpec((1, classes_p), lambda i: (0, 0)),
        ],
        out_specs=pl.BlockSpec((N, classes_p), lambda i: (0, 0)),
        compiler_params=pltpu.CompilerParams(vmem_limit_bytes=VMEM_LIMIT),
    )(x3, w, b.reshape(1, classes_p))


# ----------------------------------------------------------------------------
# Glue (im2col, parameter construction, network plumbing) -- plain JAX
# ----------------------------------------------------------------------------
def im2col(x_nhwc, K, stride, pad):
    xp = jnp.pad(x_nhwc, ((0, 0), (pad, pad), (pad, pad), (0, 0)))
    N, Hp, Wp, C = xp.shape
    Ho = (Hp - K) // stride + 1
    Wo = (Wp - K) // stride + 1
    cols = []
    for i in range(K):
        for j in range(K):
            cols.append(
                xp[:, i:i + (Ho - 1) * stride + 1:stride,
                      j:j + (Wo - 1) * stride + 1:stride, :]
            )
    patches = jnp.concatenate(cols, axis=-1)   # (kh, kw, cin) ordering
    return patches.reshape(N * Ho * Wo, K * K * C), (N, Ho, Wo)


def fold_bn(gamma, beta, mean, var, eps=BN_EPS):
    scale = gamma / jnp.sqrt(var + eps)
    bias = beta - mean * scale
    return scale, bias


def bn_params(channels, gamma_value=1.0):
    gamma = jnp.full((channels,), gamma_value, jnp.float32)
    beta = jnp.zeros((channels,), jnp.float32)
    mean = jnp.zeros((channels,), jnp.float32)
    var = jnp.ones((channels,), jnp.float32)
    return fold_bn(gamma, beta, mean, var)


def padded_bn(channels, channels_p, gamma_value=1.0):
    s, b = bn_params(channels, gamma_value)
    return (_pad_to(s, channels_p, value=1.0),
            _pad_to(b, channels_p, value=0.0))


def msra_conv(key, cout, cin, k):
    fan_out = cout * k * k
    std = (2.0 / fan_out) ** 0.5
    return jax.random.normal(key, (cout, cin, k, k), jnp.float32) * std


def build_params(key, cfg_stages, first_channels, last_channels, classes):
    keys = iter(jax.random.split(key, 64))
    params = {}
    fc_p = _round_up(first_channels, LANE)

    # conv1: 3x3 stride 2, Cin=3 -> first_channels, BN + relu6 (im2col form)
    w = msra_conv(next(keys), first_channels, 3, 3)              # (cout, cin, k, k)
    w_mat = jnp.transpose(w, (2, 3, 1, 0)).reshape(27, first_channels)
    k_pad = 32                                                   # 27 -> 32
    w_mat = jnp.pad(w_mat, ((0, k_pad - 27), (0, fc_p - first_channels)))
    s, b = padded_bn(first_channels, fc_p)
    params["conv1"] = {"w": w_mat.astype(jnp.bfloat16), "scale": s, "bias": b,
                       "k_pad": k_pad}

    blocks = []
    in_channels = first_channels
    for _, stage_cfg in cfg_stages.items():
        for (k, ic, oc, stride, t) in stage_cfg:
            assert ic == in_channels
            hidden = ic * t
            ic_p = _round_up(ic, LANE)
            oc_p = _round_up(oc, LANE)
            hd_p = _round_up(hidden, LANE)
            pad = (k - 1) // 2
            use_shortcut = (stride == 1) and (ic == oc)
            blk = {"stride": stride, "pad": pad, "use_shortcut": use_shortcut}
            if t != 1:
                we = msra_conv(next(keys), hidden, ic, 1)        # expand 1x1
                we = jnp.pad(we[:, :, 0, 0].T, ((0, ic_p - ic), (0, hd_p - hidden)))
                se, be = padded_bn(hidden, hd_p)
                blk["expand"] = {"w": we.astype(jnp.bfloat16), "scale": se, "bias": be}
            wd = msra_conv(next(keys), hidden, 1, k)             # depthwise (c,1,k,k)
            wd = jnp.transpose(wd[:, 0, :, :], (1, 2, 0))        # (k, k, hidden)
            wd = _pad_to(wd, hd_p)
            sd, bd = padded_bn(hidden, hd_p)
            blk["dw"] = {"w": wd.astype(jnp.bfloat16), "scale": sd, "bias": bd}
            wp = msra_conv(next(keys), oc, hidden, 1)            # project 1x1
            wp = jnp.pad(wp[:, :, 0, 0].T, ((0, hd_p - hidden), (0, oc_p - oc)))
            sp, bp = padded_bn(oc, oc_p, gamma_value=0.0 if use_shortcut else 1.0)
            blk["project"] = {"w": wp.astype(jnp.bfloat16), "scale": sp, "bias": bp}
            blocks.append(blk)
            in_channels = oc
    params["blocks"] = blocks

    in_p = _round_up(in_channels, LANE)
    lc_p = _round_up(last_channels, LANE)
    wl = msra_conv(next(keys), last_channels, in_channels, 1)
    wl = jnp.pad(wl[:, :, 0, 0].T, ((0, in_p - in_channels), (0, lc_p - last_channels)))
    sl, bl = padded_bn(last_channels, lc_p)
    params["last_conv"] = {"w": wl.astype(jnp.bfloat16), "scale": sl, "bias": bl}

    # output linear (xavier init, zero bias), padded to lane-dense classes
    cls_p = _round_up(classes, LANE)
    std = (2.0 / (last_channels + classes)) ** 0.5
    wo = jax.random.normal(next(keys), (last_channels, classes), jnp.float32) * std
    wo = jnp.pad(wo, ((0, lc_p - last_channels), (0, cls_p - classes)))
    params["output"] = {"w": wo, "b": jnp.zeros((cls_p,), jnp.float32),
                        "classes": classes}
    return params


def conv1x1_bn(x_nhwc, w, scale, bias, act):
    N, H, W, C = x_nhwc.shape
    y = matmul_bn_act(x_nhwc.reshape(N * H * W, C), w, scale, bias, act)
    return y.reshape(N, H, W, -1)


def linear_bottleneck(x, blk):
    out = x
    if "expand" in blk:
        e = blk["expand"]
        out = conv1x1_bn(out, e["w"], e["scale"], e["bias"], "relu6")
    residual = x if blk["use_shortcut"] else None
    # depthwise + BN + relu6 + project 1x1 + BN (+ residual) in one kernel
    out = dw_project(out, blk["dw"], blk["project"], blk["stride"], blk["pad"],
                     residual=residual)
    return out


def mobilenetv2_forward(params, x_nchw):
    x = jnp.transpose(x_nchw, (0, 2, 3, 1)).astype(jnp.bfloat16)  # NCHW -> NHWC
    # conv1 (3x3, stride 2, pad 1) via im2col + row-tiled fused matmul/BN/relu6
    cols, (N, Ho, Wo) = im2col(x, 3, 2, 1)
    p = params["conv1"]
    cols = _pad_to(cols, p["k_pad"])
    x = matmul_bn_act(cols, p["w"], p["scale"], p["bias"], "relu6")
    x = x.reshape(N, Ho, Wo, -1)
    # inverted-residual stages
    for blk in params["blocks"]:
        x = linear_bottleneck(x, blk)
    # last 1x1 conv
    p = params["last_conv"]
    x = conv1x1_bn(x, p["w"], p["scale"], p["bias"], "relu6")
    # AvgPool2d(7) + flatten + Linear (spatial must be 7x7, as in the module)
    assert x.shape[1] == 7 and x.shape[2] == 7
    out = pool_linear(x, params["output"]["w"], params["output"]["b"])
    return out[:, :params["output"]["classes"]]


# ----------------------------------------------------------------------------
if __name__ == "__main__":
    # Small config consistent with the module: (k, in_c, out_c, stride, t)
    cfg_stages = {
        "stage1": [(3, 8, 8, 1, 1)],    # t=1, stride 1 -> shortcut branch
        "stage2": [(3, 8, 16, 2, 6)],   # t=6, stride 2 -> expand/dw/project
    }
    first_channels = 8
    last_channels = 32
    classes = 10

    key = jax.random.PRNGKey(0)
    pkey, xkey = jax.random.split(key)
    params = build_params(pkey, cfg_stages, first_channels, last_channels, classes)

    # input: NCHW, spatial 28 so that the final feature map is 7x7 (AvgPool2d(7))
    x = jax.random.normal(xkey, (2, 3, 28, 28), jnp.float32)

    logits = mobilenetv2_forward(params, x)
    jax.block_until_ready(logits)
    assert logits.shape == (2, classes)
    assert bool(jnp.all(jnp.isfinite(logits)))
    print("KERNEL_OK")
</pallas_src>

<mosaic_0001>
module attributes {stable_mosaic.version = 11 : i64} {
  func.func @_matmul_bn_act_kernel(%arg0: i32, %arg1: memref<400x32xbf16, #tpu.memory_space<vmem>>, %arg2: memref<32x128xbf16, #tpu.memory_space<vmem>>, %arg3: memref<1x128xf32, #tpu.memory_space<vmem>>, %arg4: memref<1x128xf32, #tpu.memory_space<vmem>>, %arg5: memref<400x128xbf16, #tpu.memory_space<vmem>>) attributes {dimension_semantics = [#tpu.dimension_semantics<parallel>], iteration_bounds = array<i64: 1>, scalar_prefetch = 0 : i64, scratch_operands = 0 : i64, tpu.core_type = #tpu.core_type<tc>, window_params = [{transform_indices = @transform_0, window_bounds = array<i64: 400, 32>}, {pipeline_mode = #tpu.pipeline_mode<synchronous>, transform_indices = @transform_1, window_bounds = array<i64: 32, 128>}, {pipeline_mode = #tpu.pipeline_mode<synchronous>, transform_indices = @transform_2, window_bounds = array<i64: 1, 128>}, {pipeline_mode = #tpu.pipeline_mode<synchronous>, transform_indices = @transform_3, window_bounds = array<i64: 1, 128>}, {transform_indices = @transform_4, window_bounds = array<i64: 400, 128>}]} {
    %c0 = arith.constant 0 : index
    %c0_0 = arith.constant 0 : index
    %0 = vector.load %arg1[%c0, %c0_0] : memref<400x32xbf16, #tpu.memory_space<vmem>>, vector<400x32xbf16>
    %c0_1 = arith.constant 0 : index
    %c0_2 = arith.constant 0 : index
    %1 = vector.load %arg2[%c0_1, %c0_2] : memref<32x128xbf16, #tpu.memory_space<vmem>>, vector<32x128xbf16>
    %cst = arith.constant dense<0.000000e+00> : vector<400x128xf32>
    %2 = tpu.matmul %0, %1, %cst {dimension_numbers = #tpu.dot_dimension_numbers<[1], [0], [0], [1], [0, 0, 1, 1], [], []>} : vector<400x32xbf16>, vector<32x128xbf16>, vector<400x128xf32> -> vector<400x128xf32>
    %c0_3 = arith.constant 0 : index
    %c0_4 = arith.constant 0 : index
    %3 = vector.load %arg3[%c0_3, %c0_4] : memref<1x128xf32, #tpu.memory_space<vmem>>, vector<1x128xf32>
    %4 = vector.broadcast %3 : vector<1x128xf32> to vector<400x128xf32>
    %5 = arith.mulf %2, %4 : vector<400x128xf32>
    %c0_5 = arith.constant 0 : index
    %c0_6 = arith.constant 0 : index
    %6 = vector.load %arg4[%c0_5, %c0_6] : memref<1x128xf32, #tpu.memory_space<vmem>>, vector<1x128xf32>
    %7 = vector.broadcast %6 : vector<1x128xf32> to vector<400x128xf32>
    %8 = arith.addf %5, %7 : vector<400x128xf32>
    %cst_7 = arith.constant 0.000000e+00 : f32
    %cst_8 = arith.constant 6.000000e+00 : f32
    %9 = vector.broadcast %cst_7 : f32 to vector<400x128xf32>
    %10 = arith.maximumf %9, %8 : vector<400x128xf32>
    %11 = vector.broadcast %cst_8 : f32 to vector<400x128xf32>
    %12 = arith.minimumf %11, %10 : vector<400x128xf32>
    %13 = arith.truncf %12 : vector<400x128xf32> to vector<400x128xbf16>
    %c0_9 = arith.constant 0 : index
    %c0_10 = arith.constant 0 : index
    %14 = vector.load %arg5[%c0_9, %c0_10] : memref<400x128xbf16, #tpu.memory_space<vmem>>, vector<400x128xbf16>
    tpu.vector_store %arg5[%c0_9, %c0_10], %13 {strides = array<i32>} : memref<400x128xbf16, #tpu.memory_space<vmem>>, vector<400x128xbf16>,
    return
  }
  func.func @transform_0(%arg0: i32) -> (i32, i32) {
    %c0_i32 = arith.constant 0 : i32
    %c0_i32_0 = arith.constant 0 : i32
    return %arg0, %c0_i32 : i32, i32
  }
  func.func @transform_1(%arg0: i32) -> (i32, i32) {
    %c0_i32 = arith.constant 0 : i32
    %c0_i32_0 = arith.constant 0 : i32
    %c0_i32_1 = arith.constant 0 : i32
    return %c0_i32, %c0_i32_0 : i32, i32
  }
  func.func @transform_2(%arg0: i32) -> (i32, i32) {
    %c0_i32 = arith.constant 0 : i32
    %c0_i32_0 = arith.constant 0 : i32
    %c0_i32_1 = arith.constant 0 : i32
    return %c0_i32, %c0_i32_0 : i32, i32
  }
  func.func @transform_3(%arg0: i32) -> (i32, i32) {
    %c0_i32 = arith.constant 0 : i32
    %c0_i32_0 = arith.constant 0 : i32
    %c0_i32_1 = arith.constant 0 : i32
    return %c0_i32, %c0_i32_0 : i32, i32
  }
  func.func @transform_4(%arg0: i32) -> (i32, i32) {
    %c0_i32 = arith.constant 0 : i32
    %c0_i32_0 = arith.constant 0 : i32
    return %arg0, %c0_i32 : i32, i32
  }
}

</mosaic_0001>

<bundles_post_ra>
// kernel: tpu_custom_call.1
= control target key start
LH: loop header
LB: loop body
LE: loop exit
PB: predicated region body
PF: predicated region fallthrough
CT: control target
= control target key end

     0   :  { %v1491_v1 = vmov 0.0   ;;  %vm1492_vm0 = vmmov 0   ;;  %vm210_vm1 = vcmask 261120   ;;  %s1794_s0 = inlined_call_operand.vmem [shape: bf16[400,32], index: 0, kind: input, shape index: {}]   ;;  %s1795_s1 = inlined_call_operand.vmem [shape: bf16[32,128], index: 1, kind: input, shape index: {}]   ;;  %s1796_s2 = inlined_call_operand.vmem [shape: f32[1,128], index: 2, kind: input, shape index: {}]   ;;  %s1797_s3 = inlined_call_operand.vmem [shape: f32[1,128], index: 3, kind: input, shape index: {}]   ;;  %s1798_s4 = inlined_call_operand.hbm [shape: bf16[400,128], index: 4, kind: output, shape index: {}]  }
   0x1   :  { %v1442_v0 = vld [vmem:[%s1795_s1 + $0x8] sm:$0xff]   ;;  %1329 = vmatprep.subr.bf16.mxu0 %v1491_v1  ;;  %1433 = vmatprep.subr.bf16.mxu1 %v1491_v1  ;;  %v1443_v2 = vld [vmem:[%s1795_s1] sm:$0xff]   ;;  %v1447_v6 = vld [vmem:[%s1794_s0 + $0x70] sm:$0xff]  }
   0x2   :  { %1330 = vmatpush3.bf16.msra.mxu0 %v1442_v0  ;;  %1435 = vmatpush3.bf16.msra.mxu1 %v1442_v0  ;;  %v1444_v3 = vld [vmem:[%s1794_s0] sm:$0xff]   ;;  %v1445_v4 = vld [vmem:[%s1794_s0 + $0x68] sm:$0xff]   ;;  %v1448_v7 = vld [vmem:[%s1794_s0 + $0x10] sm:$0xff]  }
   0x3   :  { %1331 = vmatprep.subr.bf16.mxu0 %v1491_v1  ;;  %1434 = vmatprep.subr.bf16.mxu1 %v1491_v1  ;;  %v1446_v5 = vld [vmem:[%s1794_s0 + $0x8] sm:$0xff]   ;;  %v1449_v8 = vld [vmem:[%s1794_s0 + $0x78] sm:$0xff]  }
   0x4   :  { %1333 = vmatprep.mubr.msk.bf16.mxu0 %vm1492_vm0, %v1491_v1  ;;  %1385 = vmatprep.mubr.msk.bf16.mxu1 %vm1492_vm0, %v1491_v1 }
   0x6   :  { %1332 = vmatpush3.bf16.msra.mxu0 %v1443_v2  ;;  %1436 = vmatpush3.bf16.msra.mxu1 %v1443_v2 }
   0x9   :  { %1334 = vmatmul.mubr.msk.bf16.vlgmr.msra.gmra.mxu0 %vm210_vm1, %v1444_v3  ;;  %1386 = vmatmul.mubr.msk.bf16.vlgmr.msra.gmra.mxu1 %vm210_vm1, %v1445_v4 }
   0xa   :  { %1337 = vmatprep.mubr.msk.bf16.mxu0 %vm1492_vm0, %v1491_v1  ;;  %1389 = vmatprep.mubr.msk.bf16.mxu1 %vm1492_vm0, %v1491_v1 }
  0x11   :  { %1338 = vmatmul.mubr.msk.bf16.gmra.mxu0 %vm210_vm1, %v1446_v5  ;;  %1390 = vmatmul.mubr.msk.bf16.gmra.mxu1 %vm210_vm1, %v1447_v6 }
  0x12   :  { %1341 = vmatprep.mubr.msk.bf16.mxu0 %vm1492_vm0, %v1491_v1  ;;  %1393 = vmatprep.mubr.msk.bf16.mxu1 %vm1492_vm0, %v1491_v1 }
  0x19   :  { %1342 = vmatmul.mubr.msk.bf16.gmra.mxu0 %vm210_vm1, %v1448_v7  ;;  %1394 = vmatmul.mubr.msk.bf16.gmra.mxu1 %vm210_vm1, %v1449_v8 }
  0x1a   :  { %1345 = vmatprep.mubr.msk.bf16.mxu0 %vm1492_vm0, %v1491_v1  ;;  %1397 = vmatprep.mubr.msk.bf16.mxu1 %vm1492_vm0, %v1491_v1 }
  0x1b   :  { %9 = vsyncpa [#allocation3], 0  ;;  %v1450_v9 = vld [vmem:[%s1794_s0 + $0x18] sm:$0xff]   ;;  %v1451_v10 = vld [vmem:[%s1794_s0 + $0x80] sm:$0xff]  }
  0x1c   :  { %v1452_v11 = vld [vmem:[%s1794_s0 + $0x20] sm:$0xff]   ;;  %v1453_v12 = vld [vmem:[%s1794_s0 + $0x88] sm:$0xff]   ;;  %v1455_v14 = vld [vmem:[%s1794_s0 + $0x90] sm:$0xff]  }
  0x1d   :  { %v1454_v13 = vld [vmem:[%s1794_s0 + $0x28] sm:$0xff]   ;;  %v1456_v15 = vld [vmem:[%s1794_s0 + $0x30] sm:$0xff]   ;;  %v1457_v16 = vld [vmem:[%s1794_s0 + $0x98] sm:$0xff]  }
  0x1e   :  { %v1458_v17 = vld [vmem:[%s1794_s0 + $0x38] sm:$0xff]   ;;  %v1459_v18 = vld [vmem:[%s1794_s0 + $0xa0] sm:$0xff]   ;;  %v1461_v20 = vld [vmem:[%s1794_s0 + $0xa8] sm:$0xff]  }
  0x1f   :  { %v1460_v19 = vld [vmem:[%s1794_s0 + $0x40] sm:$0xff]   ;;  %v1462_v21 = vld [vmem:[%s1794_s0 + $0x48] sm:$0xff]   ;;  %v1463_v22 = vld [vmem:[%s1794_s0 + $0xb0] sm:$0xff]  }
  0x20   :  { %v1464_v23 = vld [vmem:[%s1794_s0 + $0x50] sm:$0xff]   ;;  %v1465_v24 = vld [vmem:[%s1794_s0 + $0xb8] sm:$0xff]   ;;  %v1467_v26 = vld [vmem:[%s1794_s0 + $0xc0] sm:$0xff]  }
  0x21   :  { %1346 = vmatmul.mubr.msk.bf16.gmra.mxu0 %vm210_vm1, %v1450_v9  ;;  %1398 = vmatmul.mubr.msk.bf16.gmra.mxu1 %vm210_vm1, %v1451_v10  ;;  %v1466_v25 = vld [vmem:[%s1794_s0 + $0x58] sm:$0xff]   ;;  %v1468_v27 = vld [vmem:[%s1794_s0 + $0x60] sm:$0xff]   ;;  %s1493_s0 = smov [#allocation2]  }
  0x22   :  { %1349 = vmatprep.mubr.msk.bf16.mxu0 %vm1492_vm0, %v1491_v1  ;;  %1401 = vmatprep.mubr.msk.bf16.mxu1 %vm1492_vm0, %v1491_v1  ;;  %v1684_v28 = vld [vmem:[%s1796_s2] ss:$0 sm:$0xff]  ;;  %s988_s2 = sshll.u32 %s1493_s0, 4  ;;  %s989_s2 = int_to_ptr.vmem [resolvable:$true] %s988_s2 }
  0x23   :  { %v1689_v30 = vld [vmem:[%s1797_s3] ss:$0 sm:$0xff]  ;;  %s1469_s3 = scalar_lea.vmem %s989_s2, 3200  ;;  %p1474_p1 = scmp.lt.s32.totalorder %s989_s2, %s989_s2 }
  0x24   :  { %p1470_p0 = scmp.ne.s32.totalorder %s989_s2, %s1469_s3  ;;  %p1475_p2 = scmp.lt.s32.totalorder %s1469_s3, %s1469_s3 }
  0x26   :  { %p1476_p3 = por %p1475_p2, %p1474_p1 }
  0x28   :  { %p1477_p4 = pnand %p1476_p3, %p1470_p0 }
  0x29   :  { %1350 = vmatmul.mubr.msk.bf16.gmra.mxu0 %vm210_vm1, %v1452_v11  ;;  %1402 = vmatmul.mubr.msk.bf16.gmra.mxu1 %vm210_vm1, %v1453_v12 }
  0x2a   :  { %1353 = vmatprep.mubr.msk.bf16.mxu0 %vm1492_vm0, %v1491_v1  ;;  %1405 = vmatprep.mubr.msk.bf16.mxu1 %vm1492_vm0, %v1491_v1 }
  0x31   :  { %1354 = vmatmul.mubr.msk.bf16.gmra.mxu0 %vm210_vm1, %v1454_v13  ;;  %1406 = vmatmul.mubr.msk.bf16.gmra.mxu1 %vm210_vm1, %v1455_v14 }
  0x32   :  { %1357 = vmatprep.mubr.msk.bf16.mxu0 %vm1492_vm0, %v1491_v1  ;;  %1409 = vmatprep.mubr.msk.bf16.mxu1 %vm1492_vm0, %v1491_v1 }
  0x39   :  { %1358 = vmatmul.mubr.msk.bf16.gmra.mxu0 %vm210_vm1, %v1456_v15  ;;  %1410 = vmatmul.mubr.msk.bf16.gmra.mxu1 %vm210_vm1, %v1457_v16 }
  0x3a   :  { %1361 = vmatprep.mubr.msk.bf16.mxu0 %vm1492_vm0, %v1491_v1  ;;  %1413 = vmatprep.mubr.msk.bf16.mxu1 %vm1492_vm0, %v1491_v1 }
  0x41   :  { %1362 = vmatmul.mubr.msk.bf16.gmra.mxu0 %vm210_vm1, %v1458_v17  ;;  %1414 = vmatmul.mubr.msk.bf16.gmra.mxu1 %vm210_vm1, %v1459_v18 }
  0x42   :  { %1365 = vmatprep.mubr.msk.bf16.mxu0 %vm1492_vm0, %v1491_v1  ;;  %1417 = vmatprep.mubr.msk.bf16.mxu1 %vm1492_vm0, %v1491_v1 }
  0x49   :  { %1366 = vmatmul.mubr.msk.bf16.gmra.mxu0 %vm210_vm1, %v1460_v19  ;;  %1418 = vmatmul.mubr.msk.bf16.gmra.mxu1 %vm210_vm1, %v1461_v20 }
  0x4a   :  { %1369 = vmatprep.mubr.msk.bf16.mxu0 %vm1492_vm0, %v1491_v1  ;;  %1421 = vmatprep.mubr.msk.bf16.mxu1 %vm1492_vm0, %v1491_v1 }
  0x51   :  { %1370 = vmatmul.mubr.msk.bf16.gmra.mxu0 %vm210_vm1, %v1462_v21  ;;  %1422 = vmatmul.mubr.msk.bf16.gmra.mxu1 %vm210_vm1, %v1463_v22 }
  0x52   :  { %1373 = vmatprep.mubr.msk.bf16.mxu0 %vm1492_vm0, %v1491_v1  ;;  %1425 = vmatprep.mubr.msk.bf16.mxu1 %vm1492_vm0, %v1491_v1 }
  0x59   :  { %1374 = vmatmul.mubr.msk.bf16.gmra.mxu0 %vm210_vm1, %v1464_v23  ;;  %1426 = vmatmul.mubr.msk.bf16.gmra.mxu1 %vm210_vm1, %v1465_v24 }
  0x5a   :  { %1377 = vmatprep.mubr.msk.bf16.mxu0 %vm1492_vm0, %v1491_v1  ;;  %1429 = vmatprep.mubr.msk.bf16.mxu1 %vm1492_vm0, %v1491_v1 }
  0x61   :  { %1378 = vmatmul.mubr.msk.bf16.gmra.mxu0 %vm210_vm1, %v1466_v25  ;;  %1430 = vmatmul.mubr.msk.bf16.gmra.mxu1 %vm210_vm1, %v1467_v26 }
  0x62   :  { %1381 = vmatprep.mubr.msk.bf16.mxu0 %vm1492_vm0, %v1491_v1 }
  0x69   :  { %1382 = vmatmul.mubr.msk.bf16.gmra.mxu0 %vm210_vm1, %v1468_v27 }
  0xc9   :  { %v320_v29 = vpop.f32.mrf.mxu0  ;;  %v424_v31 = vpop.f32.mrf.mxu1 }
  0xca   :  { %v526_v32 = vmul.f32 %v1684_v28, %v320_v29  ;;  %v552_v33 = vmul.f32 %v1684_v28, %v424_v31 }
  0xcb   :  { %v1335_v34 = vpop.f32.mrf.mxu0  ;;  %v1387_v35 = vpop.f32.mrf.mxu1 }
  0xcc   :  { %v583_v36 = vadd.f32 %v1689_v30, %v526_v32  ;;  %v609_v37 = vadd.f32 %v1689_v30, %v552_v33 }
  0xcd   :  { %v323_v38 = vpop.f32.mrf.mxu0  ;;  %v427_v39 = vpop.f32.mrf.mxu1 }
  0xce   :  { %v659_v40 = vmax.f32 %v609_v37, 0.0  ;;  %v527_v41 = vmul.f32 %v1684_v28, %v323_v38  ;;  %v553_v42 = vmul.f32 %v1684_v28, %v427_v39  ;;  %v633_v45 = vmax.f32 %v583_v36, 0.0 }
  0xcf   :  { %v1336_v43 = vpop.f32.mrf.mxu0  ;;  %v1388_v44 = vpop.f32.mrf.mxu1 }
  0xd0   :  { %v584_v46 = vadd.f32 %v1689_v30, %v527_v41  ;;  %v610_v47 = vadd.f32 %v1689_v30, %v553_v42  ;;  %v709_v48 = vmin.f32 %v659_v40, 6.0  ;;  %v683_v57 = vmin.f32 %v633_v45, 6.0 }
  0xd1   :  { %v328_v49 = vpop.f32.mrf.mxu0  ;;  %v432_v50 = vpop.f32.mrf.mxu1 }
  0xd2   :  { %v634_v51 = vmax.f32 %v584_v46, 0.0  ;;  %v660_v52 = vmax.f32 %v610_v47, 0.0  ;;  %v528_v53 = vmul.f32 %v1684_v28, %v328_v49  ;;  %v554_v54 = vmul.f32 %v1684_v28, %v432_v50 }
  0xd3   :  { %v1339_v55 = vpop.f32.mrf.mxu0  ;;  %v1391_v56 = vpop.f32.mrf.mxu1 }
  0xd4   :  { %v684_v58 = vmin.f32 %v634_v51, 6.0  ;;  %v710_v59 = vmin.f32 %v660_v52, 6.0  ;;  %v611_v60 = vadd.f32 %v1689_v30, %v554_v54  ;;  %v585_v61 = vadd.f32 %v1689_v30, %v528_v53 }
  0xd5   :  { %v331_v62 = vpop.f32.mrf.mxu0  ;;  %v435_v63 = vpop.f32.mrf.mxu1 }
  0xd6   :  { %v1156_v0 = vpack.c.bf16 %v684_v58, %v683_v57  ;;  %v1221_v1 = vpack.c.bf16 %v710_v59, %v709_v48  ;;  %v661_v2 = vmax.f32 %v611_v60, 0.0  ;;  %v529_v3 = vmul.f32 %v1684_v28, %v331_v62 }
  0xd7   :  { %v1340_v4 = vpop.f32.mrf.mxu0  ;;  %v555_v5 = vmul.f32 %v1684_v28, %v435_v63  ;;  %v1392_v6 = vpop.f32.mrf.mxu1  ;;  %v635_v7 = vmax.f32 %v585_v61, 0.0 }
  0xd8   :  { %1157 = vst [vmem:[#allocation2] sm:$0xff] %v1156_v0   ;;  %1290 = vst [vmem:[#allocation2 + $0x68] sm:$0xff] %v1221_v1   ;;  %v586_v8 = vadd.f32 %v1689_v30, %v529_v3  ;;  %v711_v14 = vmin.f32 %v661_v2, 6.0 }
  0xd9   :  { %v612_v9 = vadd.f32 %v1689_v30, %v555_v5  ;;  %v336_v10 = vpop.f32.mrf.mxu0  ;;  %v440_v11 = vpop.f32.mrf.mxu1  ;;  %v685_v21 = vmin.f32 %v635_v7, 6.0 }
  0xda   :  { %v530_v12 = vmul.f32 %v1684_v28, %v336_v10  ;;  %v556_v13 = vmul.f32 %v1684_v28, %v440_v11  ;;  %v636_v15 = vmax.f32 %v586_v8, 0.0 }
  0xdb   :  { %v662_v16 = vmax.f32 %v612_v9, 0.0  ;;  %v1343_v17 = vpop.f32.mrf.mxu0  ;;  %v1395_v18 = vpop.f32.mrf.mxu1 }
  0xdc   :  { %v587_v19 = vadd.f32 %v1689_v30, %v530_v12  ;;  %v613_v20 = vadd.f32 %v1689_v30, %v556_v13  ;;  %v686_v22 = vmin.f32 %v636_v15, 6.0 }
  0xdd   :  { %v712_v23 = vmin.f32 %v662_v16, 6.0  ;;  %v339_v24 = vpop.f32.mrf.mxu0  ;;  %v443_v25 = vpop.f32.mrf.mxu1 }
  0xde   :  { %v663_v26 = vmax.f32 %v613_v20, 0.0  ;;  %v531_v27 = vmul.f32 %v1684_v28, %v339_v24  ;;  %v557_v29 = vmul.f32 %v1684_v28, %v443_v25  ;;  %v1161_v31 = vpack.c.bf16 %v686_v22, %v685_v21 }
  0xdf   :  { %v1226_v32 = vpack.c.bf16 %v712_v23, %v711_v14  ;;  %v1344_v33 = vpop.f32.mrf.mxu0  ;;  %v1396_v34 = vpop.f32.mrf.mxu1  ;;  %v637_v35 = vmax.f32 %v587_v19, 0.0 }
  0xe0   :  { %v588_v36 = vadd.f32 %v1689_v30, %v531_v27  ;;  %v614_v37 = vadd.f32 %v1689_v30, %v557_v29  ;;  %1278 = vst [vmem:[#allocation2 + $0x8] sm:$0xff] %v1161_v31   ;;  %v713_v38 = vmin.f32 %v663_v26, 6.0 }
  0xe1   :  { %1291 = vst [vmem:[#allocation2 + $0x70] sm:$0xff] %v1226_v32   ;;  %v344_v39 = vpop.f32.mrf.mxu0  ;;  %v448_v40 = vpop.f32.mrf.mxu1  ;;  %v687_v47 = vmin.f32 %v637_v35, 6.0 }
  0xe2   :  { %v638_v41 = vmax.f32 %v588_v36, 0.0  ;;  %v664_v42 = vmax.f32 %v614_v37, 0.0  ;;  %v532_v43 = vmul.f32 %v1684_v28, %v344_v39  ;;  %v558_v44 = vmul.f32 %v1684_v28, %v448_v40 }
  0xe3   :  { %v1347_v45 = vpop.f32.mrf.mxu0  ;;  %v1399_v46 = vpop.f32.mrf.mxu1 }
  0xe4   :  { %v688_v48 = vmin.f32 %v638_v41, 6.0  ;;  %v714_v49 = vmin.f32 %v664_v42, 6.0  ;;  %v615_v50 = vadd.f32 %v1689_v30, %v558_v44  ;;  %v589_v51 = vadd.f32 %v1689_v30, %v532_v43 }
  0xe5   :  { %v347_v52 = vpop.f32.mrf.mxu0  ;;  %v451_v53 = vpop.f32.mrf.mxu1 }
  0xe6   :  { %v1166_v54 = vpack.c.bf16 %v688_v48, %v687_v47  ;;  %v1231_v55 = vpack.c.bf16 %v714_v49, %v713_v38  ;;  %v665_v56 = vmax.f32 %v615_v50, 0.0  ;;  %v533_v57 = vmul.f32 %v1684_v28, %v347_v52 }
  0xe7   :  { %v1348_v58 = vpop.f32.mrf.mxu0  ;;  %v559_v59 = vmul.f32 %v1684_v28, %v451_v53  ;;  %v1400_v60 = vpop.f32.mrf.mxu1  ;;  %v639_v61 = vmax.f32 %v589_v51, 0.0 }
  0xe8   :  { %1279 = vst [vmem:[#allocation2 + $0x10] sm:$0xff] %v1166_v54   ;;  %1292 = vst [vmem:[#allocation2 + $0x78] sm:$0xff] %v1231_v55   ;;  %v590_v62 = vadd.f32 %v1689_v30, %v533_v57  ;;  %v715_v4 = vmin.f32 %v665_v56, 6.0 }
  0xe9   :  { %v616_v63 = vadd.f32 %v1689_v30, %v559_v59  ;;  %v352_v0 = vpop.f32.mrf.mxu0  ;;  %v456_v1 = vpop.f32.mrf.mxu1  ;;  %v689_v11 = vmin.f32 %v639_v61, 6.0 }
  0xea   :  { %v534_v2 = vmul.f32 %v1684_v28, %v352_v0  ;;  %v560_v3 = vmul.f32 %v1684_v28, %v456_v1  ;;  %v640_v5 = vmax.f32 %v590_v62, 0.0 }
  0xeb   :  { %v666_v6 = vmax.f32 %v616_v63, 0.0  ;;  %v1351_v7 = vpop.f32.mrf.mxu0  ;;  %v1403_v8 = vpop.f32.mrf.mxu1 }
  0xec   :  { %v591_v9 = vadd.f32 %v1689_v30, %v534_v2  ;;  %v617_v10 = vadd.f32 %v1689_v30, %v560_v3  ;;  %v690_v12 = vmin.f32 %v640_v5, 6.0 }
  0xed   :  { %v716_v13 = vmin.f32 %v666_v6, 6.0  ;;  %v355_v14 = vpop.f32.mrf.mxu0  ;;  %v459_v15 = vpop.f32.mrf.mxu1 }
  0xee   :  { %v667_v16 = vmax.f32 %v617_v10, 0.0  ;;  %v535_v17 = vmul.f32 %v1684_v28, %v355_v14  ;;  %v561_v18 = vmul.f32 %v1684_v28, %v459_v15  ;;  %v1171_v19 = vpack.c.bf16 %v690_v12, %v689_v11 }
  0xef   :  { %v1236_v20 = vpack.c.bf16 %v716_v13, %v715_v4  ;;  %v1352_v21 = vpop.f32.mrf.mxu0  ;;  %v1404_v22 = vpop.f32.mrf.mxu1  ;;  %v641_v23 = vmax.f32 %v591_v9, 0.0 }
  0xf0   :  { %v592_v24 = vadd.f32 %v1689_v30, %v535_v17  ;;  %v618_v25 = vadd.f32 %v1689_v30, %v561_v18  ;;  %1280 = vst [vmem:[#allocation2 + $0x18] sm:$0xff] %v1171_v19   ;;  %v717_v26 = vmin.f32 %v667_v16, 6.0 }
  0xf1   :  { %1293 = vst [vmem:[#allocation2 + $0x80] sm:$0xff] %v1236_v20   ;;  %v360_v27 = vpop.f32.mrf.mxu0  ;;  %v464_v29 = vpop.f32.mrf.mxu1  ;;  %v691_v37 = vmin.f32 %v641_v23, 6.0 }
  0xf2   :  { %v642_v31 = vmax.f32 %v592_v24, 0.0  ;;  %v668_v32 = vmax.f32 %v618_v25, 0.0  ;;  %v536_v33 = vmul.f32 %v1684_v28, %v360_v27  ;;  %v562_v34 = vmul.f32 %v1684_v28, %v464_v29 }
  0xf3   :  { %v1355_v35 = vpop.f32.mrf.mxu0  ;;  %v1407_v36 = vpop.f32.mrf.mxu1 }
  0xf4   :  { %v692_v38 = vmin.f32 %v642_v31, 6.0  ;;  %v718_v39 = vmin.f32 %v668_v32, 6.0  ;;  %v619_v40 = vadd.f32 %v1689_v30, %v562_v34  ;;  %v593_v41 = vadd.f32 %v1689_v30, %v536_v33 }
  0xf5   :  { %v363_v42 = vpop.f32.mrf.mxu0  ;;  %v467_v43 = vpop.f32.mrf.mxu1 }
  0xf6   :  { %v1176_v44 = vpack.c.bf16 %v692_v38, %v691_v37  ;;  %v1241_v45 = vpack.c.bf16 %v718_v39, %v717_v26  ;;  %v669_v46 = vmax.f32 %v619_v40, 0.0  ;;  %v537_v47 = vmul.f32 %v1684_v28, %v363_v42 }
  0xf7   :  { %v1356_v48 = vpop.f32.mrf.mxu0  ;;  %v563_v49 = vmul.f32 %v1684_v28, %v467_v43  ;;  %v1408_v50 = vpop.f32.mrf.mxu1  ;;  %v643_v51 = vmax.f32 %v593_v41, 0.0 }
  0xf8   :  { %1281 = vst [vmem:[#allocation2 + $0x20] sm:$0xff] %v1176_v44   ;;  %1294 = vst [vmem:[#allocation2 + $0x88] sm:$0xff] %v1241_v45   ;;  %v594_v52 = vadd.f32 %v1689_v30, %v537_v47  ;;  %v719_v58 = vmin.f32 %v669_v46, 6.0 }
  0xf9   :  { %v620_v53 = vadd.f32 %v1689_v30, %v563_v49  ;;  %v368_v54 = vpop.f32.mrf.mxu0  ;;  %v472_v55 = vpop.f32.mrf.mxu1  ;;  %v693_v1 = vmin.f32 %v643_v51, 6.0 }
  0xfa   :  { %v538_v56 = vmul.f32 %v1684_v28, %v368_v54  ;;  %v564_v57 = vmul.f32 %v1684_v28, %v472_v55  ;;  %v644_v59 = vmax.f32 %v594_v52, 0.0 }
  0xfb   :  { %v670_v60 = vmax.f32 %v620_v53, 0.0  ;;  %v1359_v61 = vpop.f32.mrf.mxu0  ;;  %v1411_v62 = vpop.f32.mrf.mxu1 }
  0xfc   :  { %v595_v63 = vadd.f32 %v1689_v30, %v538_v56  ;;  %v621_v0 = vadd.f32 %v1689_v30, %v564_v57  ;;  %v694_v2 = vmin.f32 %v644_v59, 6.0 }
  0xfd   :  { %v720_v3 = vmin.f32 %v670_v60, 6.0  ;;  %v371_v4 = vpop.f32.mrf.mxu0  ;;  %v475_v5 = vpop.f32.mrf.mxu1 }
  0xfe   :  { %v671_v6 = vmax.f32 %v621_v0, 0.0  ;;  %v539_v7 = vmul.f32 %v1684_v28, %v371_v4  ;;  %v565_v8 = vmul.f32 %v1684_v28, %v475_v5  ;;  %v1181_v9 = vpack.c.bf16 %v694_v2, %v693_v1 }
  0xff   :  { %v1246_v10 = vpack.c.bf16 %v720_v3, %v719_v58  ;;  %v1360_v11 = vpop.f32.mrf.mxu0  ;;  %v1412_v12 = vpop.f32.mrf.mxu1  ;;  %v645_v13 = vmax.f32 %v595_v63, 0.0 }
 0x100   :  { %v596_v14 = vadd.f32 %v1689_v30, %v539_v7  ;;  %v622_v15 = vadd.f32 %v1689_v30, %v565_v8  ;;  %1282 = vst [vmem:[#allocation2 + $0x28] sm:$0xff] %v1181_v9   ;;  %v721_v16 = vmin.f32 %v671_v6, 6.0 }
 0x101   :  { %1295 = vst [vmem:[#allocation2 + $0x90] sm:$0xff] %v1246_v10   ;;  %v376_v17 = vpop.f32.mrf.mxu0  ;;  %v480_v18 = vpop.f32.mrf.mxu1  ;;  %v695_v25 = vmin.f32 %v645_v13, 6.0 }
 0x102   :  { %v646_v19 = vmax.f32 %v596_v14, 0.0  ;;  %v672_v20 = vmax.f32 %v622_v15, 0.0  ;;  %v540_v21 = vmul.f32 %v1684_v28, %v376_v17  ;;  %v566_v22 = vmul.f32 %v1684_v28, %v480_v18 }
 0x103   :  { %v1363_v23 = vpop.f32.mrf.mxu0  ;;  %v1415_v24 = vpop.f32.mrf.mxu1 }
 0x104   :  { %v696_v26 = vmin.f32 %v646_v19, 6.0  ;;  %v722_v27 = vmin.f32 %v672_v20, 6.0  ;;  %v623_v29 = vadd.f32 %v1689_v30, %v566_v22  ;;  %v597_v31 = vadd.f32 %v1689_v30, %v540_v21 }
 0x105   :  { %v379_v32 = vpop.f32.mrf.mxu0  ;;  %v483_v33 = vpop.f32.mrf.mxu1 }
 0x106   :  { %v1186_v34 = vpack.c.bf16 %v696_v26, %v695_v25  ;;  %v1251_v35 = vpack.c.bf16 %v722_v27, %v721_v16  ;;  %v673_v36 = vmax.f32 %v623_v29, 0.0  ;;  %v541_v37 = vmul.f32 %v1684_v28, %v379_v32 }
 0x107   :  { %v1364_v38 = vpop.f32.mrf.mxu0  ;;  %v567_v39 = vmul.f32 %v1684_v28, %v483_v33  ;;  %v1416_v40 = vpop.f32.mrf.mxu1  ;;  %v647_v41 = vmax.f32 %v597_v31, 0.0 }
 0x108   :  { %1283 = vst [vmem:[#allocation2 + $0x30] sm:$0xff] %v1186_v34   ;;  %1296 = vst [vmem:[#allocation2 + $0x98] sm:$0xff] %v1251_v35   ;;  %v598_v42 = vadd.f32 %v1689_v30, %v541_v37  ;;  %v723_v48 = vmin.f32 %v673_v36, 6.0 }
 0x109   :  { %v624_v43 = vadd.f32 %v1689_v30, %v567_v39  ;;  %v384_v44 = vpop.f32.mrf.mxu0  ;;  %v488_v45 = vpop.f32.mrf.mxu1  ;;  %v697_v55 = vmin.f32 %v647_v41, 6.0 }
 0x10a   :  { %v542_v46 = vmul.f32 %v1684_v28, %v384_v44  ;;  %v568_v47 = vmul.f32 %v1684_v28, %v488_v45  ;;  %v648_v49 = vmax.f32 %v598_v42, 0.0 }
 0x10b   :  { %v674_v50 = vmax.f32 %v624_v43, 0.0  ;;  %v1367_v51 = vpop.f32.mrf.mxu0  ;;  %v1419_v52 = vpop.f32.mrf.mxu1 }
 0x10c   :  { %v599_v53 = vadd.f32 %v1689_v30, %v542_v46  ;;  %v625_v54 = vadd.f32 %v1689_v30, %v568_v47  ;;  %v698_v56 = vmin.f32 %v648_v49, 6.0 }
 0x10d   :  { %v724_v57 = vmin.f32 %v674_v50, 6.0  ;;  %v387_v58 = vpop.f32.mrf.mxu0  ;;  %v491_v59 = vpop.f32.mrf.mxu1 }
 0x10e   :  { %v675_v60 = vmax.f32 %v625_v54, 0.0  ;;  %v543_v61 = vmul.f32 %v1684_v28, %v387_v58  ;;  %v569_v62 = vmul.f32 %v1684_v28, %v491_v59  ;;  %v1191_v63 = vpack.c.bf16 %v698_v56, %v697_v55 }
 0x10f   :  { %v1256_v0 = vpack.c.bf16 %v724_v57, %v723_v48  ;;  %v1368_v1 = vpop.f32.mrf.mxu0  ;;  %v1420_v2 = vpop.f32.mrf.mxu1  ;;  %v649_v3 = vmax.f32 %v599_v53, 0.0 }
 0x110   :  { %v600_v4 = vadd.f32 %v1689_v30, %v543_v61  ;;  %v626_v5 = vadd.f32 %v1689_v30, %v569_v62  ;;  %1284 = vst [vmem:[#allocation2 + $0x38] sm:$0xff] %v1191_v63   ;;  %v725_v6 = vmin.f32 %v675_v60, 6.0 }
 0x111   :  { %1297 = vst [vmem:[#allocation2 + $0xa0] sm:$0xff] %v1256_v0   ;;  %v392_v7 = vpop.f32.mrf.mxu0  ;;  %v496_v8 = vpop.f32.mrf.mxu1  ;;  %v699_v15 = vmin.f32 %v649_v3, 6.0 }
 0x112   :  { %v650_v9 = vmax.f32 %v600_v4, 0.0  ;;  %v676_v10 = vmax.f32 %v626_v5, 0.0  ;;  %v544_v11 = vmul.f32 %v1684_v28, %v392_v7  ;;  %v570_v12 = vmul.f32 %v1684_v28, %v496_v8 }
 0x113   :  { %v1371_v13 = vpop.f32.mrf.mxu0  ;;  %v1423_v14 = vpop.f32.mrf.mxu1 }
 0x114   :  { %v700_v16 = vmin.f32 %v650_v9, 6.0  ;;  %v726_v17 = vmin.f32 %v676_v10, 6.0  ;;  %v627_v18 = vadd.f32 %v1689_v30, %v570_v12  ;;  %v601_v19 = vadd.f32 %v1689_v30, %v544_v11 }
 0x115   :  { %v395_v20 = vpop.f32.mrf.mxu0  ;;  %v499_v21 = vpop.f32.mrf.mxu1 }
 0x116   :  { %v1196_v22 = vpack.c.bf16 %v700_v16, %v699_v15  ;;  %v1261_v23 = vpack.c.bf16 %v726_v17, %v725_v6  ;;  %v677_v24 = vmax.f32 %v627_v18, 0.0  ;;  %v545_v25 = vmul.f32 %v1684_v28, %v395_v20 }
 0x117   :  { %v1372_v26 = vpop.f32.mrf.mxu0  ;;  %v571_v27 = vmul.f32 %v1684_v28, %v499_v21  ;;  %v1424_v29 = vpop.f32.mrf.mxu1  ;;  %v651_v31 = vmax.f32 %v601_v19, 0.0 }
 0x118   :  { %1285 = vst [vmem:[#allocation2 + $0x40] sm:$0xff] %v1196_v22   ;;  %1298 = vst [vmem:[#allocation2 + $0xa8] sm:$0xff] %v1261_v23   ;;  %v602_v32 = vadd.f32 %v1689_v30, %v545_v25  ;;  %v727_v38 = vmin.f32 %v677_v24, 6.0 }
 0x119   :  { %v628_v33 = vadd.f32 %v1689_v30, %v571_v27  ;;  %v400_v34 = vpop.f32.mrf.mxu0  ;;  %v504_v35 = vpop.f32.mrf.mxu1  ;;  %v701_v45 = vmin.f32 %v651_v31, 6.0 }
 0x11a   :  { %v546_v36 = vmul.f32 %v1684_v28, %v400_v34  ;;  %v572_v37 = vmul.f32 %v1684_v28, %v504_v35  ;;  %v652_v39 = vmax.f32 %v602_v32, 0.0 }
 0x11b   :  { %v678_v40 = vmax.f32 %v628_v33, 0.0  ;;  %v1375_v41 = vpop.f32.mrf.mxu0  ;;  %v1427_v42 = vpop.f32.mrf.mxu1 }
 0x11c   :  { %v603_v43 = vadd.f32 %v1689_v30, %v546_v36  ;;  %v629_v44 = vadd.f32 %v1689_v30, %v572_v37  ;;  %v702_v46 = vmin.f32 %v652_v39, 6.0 }
 0x11d   :  { %v728_v47 = vmin.f32 %v678_v40, 6.0  ;;  %v403_v48 = vpop.f32.mrf.mxu0  ;;  %v507_v49 = vpop.f32.mrf.mxu1 }
 0x11e   :  { %v679_v50 = vmax.f32 %v629_v44, 0.0  ;;  %v547_v51 = vmul.f32 %v1684_v28, %v403_v48  ;;  %v573_v52 = vmul.f32 %v1684_v28, %v507_v49  ;;  %v1201_v53 = vpack.c.bf16 %v702_v46, %v701_v45 }
 0x11f   :  { %v1266_v54 = vpack.c.bf16 %v728_v47, %v727_v38  ;;  %v1376_v55 = vpop.f32.mrf.mxu0  ;;  %v1428_v56 = vpop.f32.mrf.mxu1  ;;  %v653_v57 = vmax.f32 %v603_v43, 0.0 }
 0x120   :  { %v604_v58 = vadd.f32 %v1689_v30, %v547_v51  ;;  %v630_v59 = vadd.f32 %v1689_v30, %v573_v52  ;;  %1286 = vst [vmem:[#allocation2 + $0x48] sm:$0xff] %v1201_v53   ;;  %v729_v60 = vmin.f32 %v679_v50, 6.0 }
 0x121   :  { %1299 = vst [vmem:[#allocation2 + $0xb0] sm:$0xff] %v1266_v54   ;;  %v408_v61 = vpop.f32.mrf.mxu0  ;;  %v512_v62 = vpop.f32.mrf.mxu1  ;;  %v703_v5 = vmin.f32 %v653_v57, 6.0 }
 0x122   :  { %v654_v63 = vmax.f32 %v604_v58, 0.0  ;;  %v680_v0 = vmax.f32 %v630_v59, 0.0  ;;  %v548_v1 = vmul.f32 %v1684_v28, %v408_v61  ;;  %v574_v2 = vmul.f32 %v1684_v28, %v512_v62 }
 0x123   :  { %v1379_v3 = vpop.f32.mrf.mxu0  ;;  %v1431_v4 = vpop.f32.mrf.mxu1 }
 0x124   :  { %v704_v6 = vmin.f32 %v654_v63, 6.0  ;;  %v730_v7 = vmin.f32 %v680_v0, 6.0  ;;  %v631_v8 = vadd.f32 %v1689_v30, %v574_v2  ;;  %v605_v9 = vadd.f32 %v1689_v30, %v548_v1 }
 0x125   :  { %v411_v10 = vpop.f32.mrf.mxu0  ;;  %v515_v11 = vpop.f32.mrf.mxu1 }
 0x126   :  { %v1206_v12 = vpack.c.bf16 %v704_v6, %v703_v5  ;;  %v1271_v13 = vpack.c.bf16 %v730_v7, %v729_v60  ;;  %v681_v14 = vmax.f32 %v631_v8, 0.0  ;;  %v549_v15 = vmul.f32 %v1684_v28, %v411_v10 }
 0x127   :  { %v1380_v16 = vpop.f32.mrf.mxu0  ;;  %v575_v17 = vmul.f32 %v1684_v28, %v515_v11  ;;  %v1432_v18 = vpop.f32.mrf.mxu1  ;;  %v655_v19 = vmax.f32 %v605_v9, 0.0 }
 0x128   :  { %1287 = vst [vmem:[#allocation2 + $0x50] sm:$0xff] %v1206_v12   ;;  %1300 = vst [vmem:[#allocation2 + $0xb8] sm:$0xff] %v1271_v13   ;;  %v606_v20 = vadd.f32 %v1689_v30, %v549_v15  ;;  %v731_v24 = vmin.f32 %v681_v14, 6.0 }
 0x129   :  { %v632_v21 = vadd.f32 %v1689_v30, %v575_v17  ;;  %v416_v22 = vpop.f32.mrf.mxu0  ;;  %v705_v31 = vmin.f32 %v655_v19, 6.0 }
 0x12a   :  { %v550_v23 = vmul.f32 %v1684_v28, %v416_v22  ;;  %v656_v25 = vmax.f32 %v606_v20, 0.0 }
 0x12b   :  { %v682_v26 = vmax.f32 %v632_v21, 0.0  ;;  %v1383_v27 = vpop.f32.mrf.mxu0 }
 0x12c   :  { %v607_v29 = vadd.f32 %v1689_v30, %v550_v23  ;;  %v706_v32 = vmin.f32 %v656_v25, 6.0 }
 0x12d   :  { %v732_v33 = vmin.f32 %v682_v26, 6.0  ;;  %v419_v34 = vpop.f32.mrf.mxu0 }
 0x12e   :  { %v551_v35 = vmul.f32 %v1684_v28, %v419_v34  ;;  %v1211_v36 = vpack.c.bf16 %v706_v32, %v705_v31  ;;  %v657_v39 = vmax.f32 %v607_v29, 0.0 }
 0x12f   :  { %v1276_v37 = vpack.c.bf16 %v732_v33, %v731_v24  ;;  %v1384_v38 = vpop.f32.mrf.mxu0 }
 0x130   :  { %v608_v40 = vadd.f32 %v1689_v30, %v551_v35  ;;  %1288 = vst [vmem:[#allocation2 + $0x58] sm:$0xff] %v1211_v36   ;;  %v707_v42 = vmin.f32 %v657_v39, 6.0 }
 0x131   :  { %1301 = vst [vmem:[#allocation2 + $0xc0] sm:$0xff] %v1276_v37  }
 0x132   :  { %v658_v41 = vmax.f32 %v608_v40, 0.0 }
 0x134   :  { %v708_v43 = vmin.f32 %v658_v41, 6.0 }
 0x136   :  { %v1216_v44 = vpack.c.bf16 %v708_v43, %v707_v42 }
 0x138   :  { %1289 = vst [vmem:[#allocation2 + $0x60] sm:$0xff] %v1216_v44  }
 0x139   :  { %1480 = shalt.err (!%p1477_p4)
}
 0x13a   :  { %s1494_s19 = smov 64   ;;  %s1495_s20 = smov 4  }
 0x13b   :  { %994 = dma.vmem_to_hbm [thread:$0]  %s989_s2, 3200, %s1798_s4, [#allocation3], %s1494_s19, %s1494_s19, %s1495_s20  }
 0x13c   :  { %1489 = dma.done.wait [#allocation3], 3200  }
 0x13d   :  { %1490 = vsyncadd [#allocation3], 4294964096 }
 0x13e   :  { %998 = vsyncpa [#allocation3], 1 }

</bundles_post_ra>
